<compile_context>
chip_gen: v6e
topology: v6e:2x2x1
jax: 0.10.0
libtpu: 0.0.40
codegen_flags: <defaults>
</compile_context>

<pallas_src>
import functools

import numpy as np

import jax
import jax.numpy as jnp
from jax.experimental import pallas as pl
from jax.experimental.pallas import tpu as pltpu


def _round_up(x, m):
    return ((x + m - 1) // m) * m


def _pick_k_tile(K, tk_req):
    """Largest K-tile <= tk_req that divides K and is a multiple of 128."""
    if K <= tk_req:
        return K
    t = (tk_req // 128) * 128
    while t >= 128:
        if K % t == 0:
            return t
        t -= 128
    return K


def _fused_infonce_kernel(pred_ref, targ0_ref, targ1_ref, w0_ref, w1_ref,
                          queue_ref, out_ref,
                          pbf_sc, m_sc, s_sc, lp0_sc, lp1_sc, *, inv_temp):
    """All crop pairs vs. the negative queue; online LSE over K-tiles."""
    k = pl.program_id(1)

    @pl.when(k == 0)
    def _init():
        p = pred_ref[...]
        # Hoist 1/T scaling + bf16 cast: done once per row tile, reused by
        # every K-tile matmul (removes a (tr, tk) VPU multiply per step).
        pbf_sc[...] = (p * inv_temp).astype(jnp.bfloat16)
        # Positive logits vs. both teacher targets (f32, already / T).
        lp0_sc[...] = jnp.sum(p * targ0_ref[...], axis=-1, keepdims=True) * inv_temp
        lp1_sc[...] = jnp.sum(p * targ1_ref[...], axis=-1, keepdims=True) * inv_temp
        # Online log-sum-exp state over the negatives only.
        m_sc[...] = jnp.full(m_sc.shape, -jnp.inf, jnp.float32)
        s_sc[...] = jnp.zeros(s_sc.shape, jnp.float32)

    # Negative logits for this K-tile (bf16 operands, f32 accumulation on MXU;
    # already scaled by 1/T via pbf_sc).
    neg = jnp.dot(pbf_sc[...], queue_ref[...],
                  preferred_element_type=jnp.float32)

    # Online log-sum-exp update over the negatives (f32).
    m_new = jnp.maximum(m_sc[...], jnp.max(neg, axis=-1, keepdims=True))
    s_sc[...] = (s_sc[...] * jnp.exp(m_sc[...] - m_new)
                 + jnp.sum(jnp.exp(neg - m_new), axis=-1, keepdims=True))
    m_sc[...] = m_new

    @pl.when(k == pl.num_programs(1) - 1)
    def _finalize():
        m_neg = m_sc[...]
        s_neg = s_sc[...]

        def pair_loss(lp):
            # CE with label 0: -lp + logsumexp([lp, negative logits]).
            m_tot = jnp.maximum(m_neg, lp)
            lse = m_tot + jnp.log(jnp.exp(lp - m_tot)
                                  + s_neg * jnp.exp(m_neg - m_tot))
            return lse - lp

        # Per-row weighted contributions; weights encode the t_idx != p_idx
        # mask and the large/small-crop bucket averaging (zero on padded rows).
        out_ref[...] = (w0_ref[...] * pair_loss(lp0_sc[...])
                        + w1_ref[...] * pair_loss(lp1_sc[...]))


def infonce_loss_forward(student_output, teacher_output, queue, ncrops,
                         temperature, *, tk=1024, tr=512):
    """Mirrors InfoNCELoss.forward (returned loss value) with one fused kernel."""
    student_output = jnp.asarray(student_output, jnp.float32)
    teacher_output = jnp.asarray(teacher_output, jnp.float32)
    N, D = student_output.shape
    B = teacher_output.shape[0] // 2
    assert N == ncrops * B
    Dq, K = queue.shape
    assert Dq == D

    inv_temp = 1.0 / float(temperature)

    # ---- per-row weights encoding pair masking + bucket averaging ----------
    large_terms = 2                       # pairs (t, p) with p < 2 and t != p
    small_terms = 2 * (ncrops - 2)        # pairs with p >= 2
    w0 = np.zeros((N, 1), np.float32)     # weight of the t=0 pair for each row
    w1 = np.zeros((N, 1), np.float32)     # weight of the t=1 pair for each row
    for p in range(ncrops):
        if p < 2:
            w = 0.5 / (large_terms * B)
        else:
            w = 0.5 / (small_terms * B) if small_terms > 0 else 0.0
        if p != 0:
            w0[p * B:(p + 1) * B, 0] = w
        if p != 1:
            w1[p * B:(p + 1) * B, 0] = w

    # ---- operands: tiled targets, row padding, bf16 queue -------------------
    targ0 = jnp.tile(teacher_output[:B], (ncrops, 1))        # (N, D)
    targ1 = jnp.tile(teacher_output[B:2 * B], (ncrops, 1))   # (N, D)

    tr = min(tr, _round_up(N, 8))
    n_pad = _round_up(N, tr)
    r_tiles = n_pad // tr
    if n_pad != N:
        pad = n_pad - N
        student_output = jnp.pad(student_output, ((0, pad), (0, 0)))
        targ0 = jnp.pad(targ0, ((0, pad), (0, 0)))
        targ1 = jnp.pad(targ1, ((0, pad), (0, 0)))
        w0 = np.pad(w0, ((0, pad), (0, 0)))
        w1 = np.pad(w1, ((0, pad), (0, 0)))
    w0 = jnp.asarray(w0)
    w1 = jnp.asarray(w1)

    tk = _pick_k_tile(K, tk)
    k_tiles = K // tk

    # TODO(synk): in a real training loop keep the queue buffer in bf16 so this
    # cast (an extra pass over the queue) is amortized instead of per-step.
    queue_bf16 = jnp.asarray(queue).astype(jnp.bfloat16)

    # ---- VMEM budget (sized for v7x's smaller VMEM; capped at 48 MiB) -------
    vmem_est = (
        2 * (D * tk * 2)                    # double-buffered bf16 queue tiles
        + 2 * 3 * (tr * D * 4)              # pred / targ0 / targ1 blocks
        + 2 * 2 * (tr * 4) + 2 * (tr * 4)   # weight + output blocks
        + tr * D * 2 + 4 * tr * 4           # scratch
        + 3 * (tr * tk * 4)                 # (tr, tk) f32 logit/exp temporaries
    )
    vmem_limit = int(min(max(2 * vmem_est, 16 << 20), 48 << 20))

    kernel = functools.partial(_fused_infonce_kernel, inv_temp=inv_temp)
    per_row = pl.pallas_call(
        kernel,
        out_shape=jax.ShapeDtypeStruct((n_pad, 1), jnp.float32),
        grid_spec=pltpu.PrefetchScalarGridSpec(
            num_scalar_prefetch=0,
            grid=(r_tiles, k_tiles),
            in_specs=[
                pl.BlockSpec((tr, D), lambda r, k: (r, 0)),    # stacked preds
                pl.BlockSpec((tr, D), lambda r, k: (r, 0)),    # targ (t=0) tiled
                pl.BlockSpec((tr, D), lambda r, k: (r, 0)),    # targ (t=1) tiled
                pl.BlockSpec((tr, 1), lambda r, k: (r, 0)),    # weights t=0
                pl.BlockSpec((tr, 1), lambda r, k: (r, 0)),    # weights t=1
                pl.BlockSpec((D, tk), lambda r, k: (0, k)),    # queue K-tile
            ],
            out_specs=pl.BlockSpec((tr, 1), lambda r, k: (r, 0)),
            scratch_shapes=[
                pltpu.VMEM((tr, D), jnp.bfloat16),   # pred * (1/T), bf16
                pltpu.VMEM((tr, 1), jnp.float32),    # running max (negatives)
                pltpu.VMEM((tr, 1), jnp.float32),    # running sum-exp (negatives)
                pltpu.VMEM((tr, 1), jnp.float32),    # positive logit vs targ0
                pltpu.VMEM((tr, 1), jnp.float32),    # positive logit vs targ1
            ],
        ),
        compiler_params=pltpu.CompilerParams(
            dimension_semantics=("parallel", "arbitrary"),
            vmem_limit_bytes=vmem_limit,
        ),
    )(student_output, targ0, targ1, w0, w1, queue_bf16)

    return jnp.sum(per_row)


def _reference_loss(student_output, teacher_output, queue, ncrops, temperature):
    """Pure-JAX (f32) reference of the PyTorch forward for a sanity check."""
    B = teacher_output.shape[0] // 2
    preds = [student_output[i * B:(i + 1) * B] for i in range(ncrops)]
    targets = [teacher_output[i * B:(i + 1) * B] for i in range(2)]
    large, small, nl, ns = 0.0, 0.0, 0, 0
    for t_idx, targ in enumerate(targets):
        for p_idx, pred in enumerate(preds):
            if t_idx == p_idx:
                continue
            l_pos = jnp.sum(pred * targ, axis=-1, keepdims=True)
            l_neg = pred @ queue
            logits = jnp.concatenate([l_pos, l_neg], axis=1) / temperature
            lse = jax.scipy.special.logsumexp(logits, axis=1)
            loss = jnp.mean(-logits[:, 0] + lse)
            if p_idx < 2:
                large, nl = large + loss, nl + 1
            else:
                small, ns = small + loss, ns + 1
    return 0.5 * (large / nl + small / ns)


if __name__ == "__main__":
    # Small, deterministic config consistent with InfoNCELoss(ncrops, dim, queue_size, T)
    ncrops = 4
    dim = 32
    queue_size = 2048
    temperature = 0.2
    batch = 8

    key = jax.random.PRNGKey(0)
    k_q, k_s, k_t = jax.random.split(key, 3)

    # register_buffer('queue', randn(dim, queue_size)); normalize along dim=0
    queue = jax.random.normal(k_q, (dim, queue_size), dtype=jnp.float32)
    queue = queue / jnp.linalg.norm(queue, axis=0, keepdims=True)

    # L2-normalized features, as produced upstream in contrastive pipelines.
    student_output = jax.random.normal(k_s, (ncrops * batch, dim), jnp.float32)
    student_output = student_output / jnp.linalg.norm(student_output, axis=1, keepdims=True)
    teacher_output = jax.random.normal(k_t, (2 * batch, dim), jnp.float32)
    teacher_output = teacher_output / jnp.linalg.norm(teacher_output, axis=1, keepdims=True)

    loss = infonce_loss_forward(student_output, teacher_output, queue,
                                ncrops, temperature)
    loss = jax.block_until_ready(loss)

    ref = _reference_loss(student_output, teacher_output, queue,
                          ncrops, temperature)
    # bf16 MXU operands for the negative logits -> loosened tolerance vs. the
    # f32 reference (LSE / positive-logit math stays f32).
    assert jnp.allclose(loss, ref, rtol=5e-2, atol=5e-2), (loss, ref)

    print("KERNEL_OK")
</pallas_src>

<mosaic_0001>
module attributes {stable_mosaic.version = 11 : i64} {
  func.func @_fused_infonce_kernel(%arg0: i32, %arg1: i32, %arg2: memref<32x32xf32, #tpu.memory_space<vmem>>, %arg3: memref<32x32xf32, #tpu.memory_space<vmem>>, %arg4: memref<32x32xf32, #tpu.memory_space<vmem>>, %arg5: memref<32x1xf32, #tpu.memory_space<vmem>>, %arg6: memref<32x1xf32, #tpu.memory_space<vmem>>, %arg7: memref<32x1024xbf16, #tpu.memory_space<vmem>>, %arg8: memref<32x1xf32, #tpu.memory_space<vmem>>, %arg9: memref<32x32xbf16, #tpu.memory_space<vmem>>, %arg10: memref<32x1xf32, #tpu.memory_space<vmem>>, %arg11: memref<32x1xf32, #tpu.memory_space<vmem>>, %arg12: memref<32x1xf32, #tpu.memory_space<vmem>>, %arg13: memref<32x1xf32, #tpu.memory_space<vmem>>) attributes {dimension_semantics = [#tpu.dimension_semantics<parallel>, #tpu.dimension_semantics<arbitrary>], iteration_bounds = array<i64: 1, 2>, scalar_prefetch = 0 : i64, scratch_operands = 5 : i64, tpu.core_type = #tpu.core_type<tc>, window_params = [{transform_indices = @transform_0, window_bounds = array<i64: 32, 32>}, {transform_indices = @transform_1, window_bounds = array<i64: 32, 32>}, {transform_indices = @transform_2, window_bounds = array<i64: 32, 32>}, {transform_indices = @transform_3, window_bounds = array<i64: 32, 1>}, {transform_indices = @transform_4, window_bounds = array<i64: 32, 1>}, {transform_indices = @transform_5, window_bounds = array<i64: 32, 1024>}, {transform_indices = @transform_6, window_bounds = array<i64: 32, 1>}]} {
    %c0_i32 = arith.constant 0 : i32
    %0 = arith.cmpi eq, %arg1, %c0_i32 : i32
    %1 = arith.extui %0 : i1 to i32
    %c0_i32_0 = arith.constant 0 : i32
    %2 = arith.cmpi ne, %1, %c0_i32_0 : i32
    scf.if %2 {
      %c0_17 = arith.constant 0 : index
      %c0_18 = arith.constant 0 : index
      %26 = vector.load %arg2[%c0_17, %c0_18] : memref<32x32xf32, #tpu.memory_space<vmem>>, vector<32x32xf32>
      %cst_19 = arith.constant 5.000000e+00 : f32
      %27 = vector.broadcast %cst_19 : f32 to vector<32x32xf32>
      %28 = arith.mulf %26, %27 : vector<32x32xf32>
      %29 = arith.truncf %28 : vector<32x32xf32> to vector<32x32xbf16>
      %c0_20 = arith.constant 0 : index
      %c0_21 = arith.constant 0 : index
      %30 = vector.load %arg9[%c0_20, %c0_21] : memref<32x32xbf16, #tpu.memory_space<vmem>>, vector<32x32xbf16>
      tpu.vector_store %arg9[%c0_20, %c0_21], %29 {strides = array<i32>} : memref<32x32xbf16, #tpu.memory_space<vmem>>, vector<32x32xbf16>,
      %c0_22 = arith.constant 0 : index
      %c0_23 = arith.constant 0 : index
      %31 = vector.load %arg3[%c0_22, %c0_23] : memref<32x32xf32, #tpu.memory_space<vmem>>, vector<32x32xf32>
      %32 = arith.mulf %26, %31 : vector<32x32xf32>
      %cst_24 = arith.constant dense<0.000000e+00> : vector<32xf32>
      %33 = vector.multi_reduction <add>, %32, %cst_24 [1] : vector<32x32xf32> to vector<32xf32>
      %34 = vector.shape_cast %33 : vector<32xf32> to vector<32x1xf32>
      %cst_25 = arith.constant 5.000000e+00 : f32
      %35 = vector.broadcast %cst_25 : f32 to vector<32x1xf32>
      %36 = arith.mulf %34, %35 : vector<32x1xf32>
      %c0_26 = arith.constant 0 : index
      %c0_27 = arith.constant 0 : index
      %37 = vector.load %arg12[%c0_26, %c0_27] : memref<32x1xf32, #tpu.memory_space<vmem>>, vector<32x1xf32>
      tpu.vector_store %arg12[%c0_26, %c0_27], %36 {strides = array<i32>} : memref<32x1xf32, #tpu.memory_space<vmem>>, vector<32x1xf32>,
      %c0_28 = arith.constant 0 : index
      %c0_29 = arith.constant 0 : index
      %38 = vector.load %arg4[%c0_28, %c0_29] : memref<32x32xf32, #tpu.memory_space<vmem>>, vector<32x32xf32>
      %39 = arith.mulf %26, %38 : vector<32x32xf32>
      %cst_30 = arith.constant dense<0.000000e+00> : vector<32xf32>
      %40 = vector.multi_reduction <add>, %39, %cst_30 [1] : vector<32x32xf32> to vector<32xf32>
      %41 = vector.shape_cast %40 : vector<32xf32> to vector<32x1xf32>
      %cst_31 = arith.constant 5.000000e+00 : f32
      %42 = vector.broadcast %cst_31 : f32 to vector<32x1xf32>
      %43 = arith.mulf %41, %42 : vector<32x1xf32>
      %c0_32 = arith.constant 0 : index
      %c0_33 = arith.constant 0 : index
      %44 = vector.load %arg13[%c0_32, %c0_33] : memref<32x1xf32, #tpu.memory_space<vmem>>, vector<32x1xf32>
      tpu.vector_store %arg13[%c0_32, %c0_33], %43 {strides = array<i32>} : memref<32x1xf32, #tpu.memory_space<vmem>>, vector<32x1xf32>,
      %cst_34 = arith.constant 0xFF800000 : f32
      %45 = vector.broadcast %cst_34 : f32 to vector<32x1xf32>
      %c0_35 = arith.constant 0 : index
      %c0_36 = arith.constant 0 : index
      %46 = vector.load %arg10[%c0_35, %c0_36] : memref<32x1xf32, #tpu.memory_space<vmem>>, vector<32x1xf32>
      tpu.vector_store %arg10[%c0_35, %c0_36], %45 {strides = array<i32>} : memref<32x1xf32, #tpu.memory_space<vmem>>, vector<32x1xf32>,
      %cst_37 = arith.constant 0.000000e+00 : f32
      %47 = vector.broadcast %cst_37 : f32 to vector<32x1xf32>
      %c0_38 = arith.constant 0 : index
      %c0_39 = arith.constant 0 : index
      %48 = vector.load %arg11[%c0_38, %c0_39] : memref<32x1xf32, #tpu.memory_space<vmem>>, vector<32x1xf32>
      tpu.vector_store %arg11[%c0_38, %c0_39], %47 {strides = array<i32>} : memref<32x1xf32, #tpu.memory_space<vmem>>, vector<32x1xf32>,
    } else {
    }
    %c0 = arith.constant 0 : index
    %c0_1 = arith.constant 0 : index
    %3 = vector.load %arg9[%c0, %c0_1] : memref<32x32xbf16, #tpu.memory_space<vmem>>, vector<32x32xbf16>
    %c0_2 = arith.constant 0 : index
    %c0_3 = arith.constant 0 : index
    %4 = vector.load %arg7[%c0_2, %c0_3] : memref<32x1024xbf16, #tpu.memory_space<vmem>>, vector<32x1024xbf16>
    %cst = arith.constant dense<0.000000e+00> : vector<32x1024xf32>
    %5 = tpu.matmul %3, %4, %cst {dimension_numbers = #tpu.dot_dimension_numbers<[1], [0], [0], [1], [0, 0, 1, 1], [], []>} : vector<32x32xbf16>, vector<32x1024xbf16>, vector<32x1024xf32> -> vector<32x1024xf32>
    %c0_4 = arith.constant 0 : index
    %c0_5 = arith.constant 0 : index
    %6 = vector.load %arg10[%c0_4, %c0_5] : memref<32x1xf32, #tpu.memory_space<vmem>>, vector<32x1xf32>
    %cst_6 = arith.constant dense<0xFF800000> : vector<32xf32>
    %7 = vector.multi_reduction <maximumf>, %5, %cst_6 [1] : vector<32x1024xf32> to vector<32xf32>
    %8 = vector.shape_cast %7 : vector<32xf32> to vector<32x1xf32>
    %9 = arith.maximumf %6, %8 : vector<32x1xf32>
    %c0_7 = arith.constant 0 : index
    %c0_8 = arith.constant 0 : index
    %10 = vector.load %arg11[%c0_7, %c0_8] : memref<32x1xf32, #tpu.memory_space<vmem>>, vector<32x1xf32>
    %c0_9 = arith.constant 0 : index
    %c0_10 = arith.constant 0 : index
    %11 = vector.load %arg10[%c0_9, %c0_10] : memref<32x1xf32, #tpu.memory_space<vmem>>, vector<32x1xf32>
    %12 = arith.subf %11, %9 : vector<32x1xf32>
    %13 = math.exp %12 : vector<32x1xf32>
    %14 = arith.mulf %10, %13 : vector<32x1xf32>
    %15 = vector.broadcast %9 : vector<32x1xf32> to vector<32x1024xf32>
    %16 = arith.subf %5, %15 : vector<32x1024xf32>
    %17 = math.exp %16 : vector<32x1024xf32>
    %cst_11 = arith.constant dense<0.000000e+00> : vector<32xf32>
    %18 = vector.multi_reduction <add>, %17, %cst_11 [1] : vector<32x1024xf32> to vector<32xf32>
    %19 = vector.shape_cast %18 : vector<32xf32> to vector<32x1xf32>
    %20 = arith.addf %14, %19 : vector<32x1xf32>
    %c0_12 = arith.constant 0 : index
    %c0_13 = arith.constant 0 : index
    %21 = vector.load %arg11[%c0_12, %c0_13] : memref<32x1xf32, #tpu.memory_space<vmem>>, vector<32x1xf32>
    tpu.vector_store %arg11[%c0_12, %c0_13], %20 {strides = array<i32>} : memref<32x1xf32, #tpu.memory_space<vmem>>, vector<32x1xf32>,
    %c0_14 = arith.constant 0 : index
    %c0_15 = arith.constant 0 : index
    %22 = vector.load %arg10[%c0_14, %c0_15] : memref<32x1xf32, #tpu.memory_space<vmem>>, vector<32x1xf32>
    tpu.vector_store %arg10[%c0_14, %c0_15], %9 {strides = array<i32>} : memref<32x1xf32, #tpu.memory_space<vmem>>, vector<32x1xf32>,
    %c1_i32 = arith.constant 1 : i32
    %23 = arith.cmpi eq, %arg1, %c1_i32 : i32
    %24 = arith.extui %23 : i1 to i32
    %c0_i32_16 = arith.constant 0 : i32
    %25 = arith.cmpi ne, %24, %c0_i32_16 : i32
    scf.if %25 {
      %c0_17 = arith.constant 0 : index
      %c0_18 = arith.constant 0 : index
      %26 = vector.load %arg10[%c0_17, %c0_18] : memref<32x1xf32, #tpu.memory_space<vmem>>, vector<32x1xf32>
      %c0_19 = arith.constant 0 : index
      %c0_20 = arith.constant 0 : index
      %27 = vector.load %arg11[%c0_19, %c0_20] : memref<32x1xf32, #tpu.memory_space<vmem>>, vector<32x1xf32>
      %c0_21 = arith.constant 0 : index
      %c0_22 = arith.constant 0 : index
      %28 = vector.load %arg5[%c0_21, %c0_22] : memref<32x1xf32, #tpu.memory_space<vmem>>, vector<32x1xf32>
      %c0_23 = arith.constant 0 : index
      %c0_24 = arith.constant 0 : index
      %29 = vector.load %arg12[%c0_23, %c0_24] : memref<32x1xf32, #tpu.memory_space<vmem>>, vector<32x1xf32>
      %30 = arith.maximumf %26, %29 : vector<32x1xf32>
      %31 = arith.subf %29, %30 : vector<32x1xf32>
      %32 = math.exp %31 : vector<32x1xf32>
      %33 = arith.subf %26, %30 : vector<32x1xf32>
      %34 = math.exp %33 : vector<32x1xf32>
      %35 = arith.mulf %27, %34 : vector<32x1xf32>
      %36 = arith.addf %32, %35 : vector<32x1xf32>
      %37 = math.log %36 : vector<32x1xf32>
      %38 = arith.addf %30, %37 : vector<32x1xf32>
      %39 = arith.subf %38, %29 : vector<32x1xf32>
      %40 = arith.mulf %28, %39 : vector<32x1xf32>
      %c0_25 = arith.constant 0 : index
      %c0_26 = arith.constant 0 : index
      %41 = vector.load %arg6[%c0_25, %c0_26] : memref<32x1xf32, #tpu.memory_space<vmem>>, vector<32x1xf32>
      %c0_27 = arith.constant 0 : index
      %c0_28 = arith.constant 0 : index
      %42 = vector.load %arg13[%c0_27, %c0_28] : memref<32x1xf32, #tpu.memory_space<vmem>>, vector<32x1xf32>
      %43 = arith.maximumf %26, %42 : vector<32x1xf32>
      %44 = arith.subf %42, %43 : vector<32x1xf32>
      %45 = math.exp %44 : vector<32x1xf32>
      %46 = arith.subf %26, %43 : vector<32x1xf32>
      %47 = math.exp %46 : vector<32x1xf32>
      %48 = arith.mulf %27, %47 : vector<32x1xf32>
      %49 = arith.addf %45, %48 : vector<32x1xf32>
      %50 = math.log %49 : vector<32x1xf32>
      %51 = arith.addf %43, %50 : vector<32x1xf32>
      %52 = arith.subf %51, %42 : vector<32x1xf32>
      %53 = arith.mulf %41, %52 : vector<32x1xf32>
      %54 = arith.addf %40, %53 : vector<32x1xf32>
      %c0_29 = arith.constant 0 : index
      %c0_30 = arith.constant 0 : index
      %55 = vector.load %arg8[%c0_29, %c0_30] : memref<32x1xf32, #tpu.memory_space<vmem>>, vector<32x1xf32>
      tpu.vector_store %arg8[%c0_29, %c0_30], %54 {strides = array<i32>} : memref<32x1xf32, #tpu.memory_space<vmem>>, vector<32x1xf32>,
    } else {
    }
    return
  }
  func.func @transform_0(%arg0: i32, %arg1: i32) -> (i32, i32) {
    %c0_i32 = arith.constant 0 : i32
    %c0_i32_0 = arith.constant 0 : i32
    return %arg0, %c0_i32 : i32, i32
  }
  func.func @transform_1(%arg0: i32, %arg1: i32) -> (i32, i32) {
    %c0_i32 = arith.constant 0 : i32
    %c0_i32_0 = arith.constant 0 : i32
    return %arg0, %c0_i32 : i32, i32
  }
  func.func @transform_2(%arg0: i32, %arg1: i32) -> (i32, i32) {
    %c0_i32 = arith.constant 0 : i32
    %c0_i32_0 = arith.constant 0 : i32
    return %arg0, %c0_i32 : i32, i32
  }
  func.func @transform_3(%arg0: i32, %arg1: i32) -> (i32, i32) {
    %c0_i32 = arith.constant 0 : i32
    %c0_i32_0 = arith.constant 0 : i32
    return %arg0, %c0_i32 : i32, i32
  }
  func.func @transform_4(%arg0: i32, %arg1: i32) -> (i32, i32) {
    %c0_i32 = arith.constant 0 : i32
    %c0_i32_0 = arith.constant 0 : i32
    return %arg0, %c0_i32 : i32, i32
  }
  func.func @transform_5(%arg0: i32, %arg1: i32) -> (i32, i32) {
    %c0_i32 = arith.constant 0 : i32
    %c0_i32_0 = arith.constant 0 : i32
    return %c0_i32, %arg1 : i32, i32
  }
  func.func @transform_6(%arg0: i32, %arg1: i32) -> (i32, i32) {
    %c0_i32 = arith.constant 0 : i32
    %c0_i32_0 = arith.constant 0 : i32
    return %arg0, %c0_i32 : i32, i32
  }
}

</mosaic_0001>

<bundles_post_ra>
// kernel: tpu_custom_call.1
= control target key start
LH: loop header
LB: loop body
LE: loop exit
PB: predicated region body
PF: predicated region fallthrough
CT: control target
= control target key end

     0   :  { %11 = vsyncpa [#allocation8], 0  ;;  %s2302_s0 = inlined_call_operand.vmem [shape: f32[32,32], index: 0, kind: input, shape index: {}]   ;;  %s2303_s1 = inlined_call_operand.vmem [shape: f32[32,32], index: 1, kind: input, shape index: {}]   ;;  %s2304_s2 = inlined_call_operand.hbm [shape: f32[32,32], index: 2, kind: input, shape index: {}]   ;;  %s2305_s3 = inlined_call_operand.vmem [shape: f32[32,1], index: 3, kind: input, shape index: {}]   ;;  %s2306_s4 = inlined_call_operand.vmem [shape: f32[32,1], index: 4, kind: input, shape index: {}]   ;;  %s2307_s5 = inlined_call_operand.hbm [shape: bf16[32,2048], index: 5, kind: input, shape index: {}]   ;;  %s2308_s6 = inlined_call_operand.vmem [shape: f32[32,1], index: 6, kind: output, shape index: {}]  }
   0x1   :  { %12 = vsyncpa [#allocation10], 0 }
   0x2   :  { %14 = vsyncpa [#allocation10 + $0x1], 0  ;;  %s1759_s21 = smov 0   ;;  %s1761_s22 = smov 0  }
   0x3   :  { %s1763_s23 = smov 0   ;;  %s1765_s24 = smov 0  }
   0x4   :  { %s1767_s25 = smov 0   ;;  %s1769_s26 = smov 0  }
   0x5 LB: > { %2311 = sst [smem:[#allocation13_spill]] %s1712_s26  ;;  %s1351_s27 = sadd.s32 4294967295, %s1712_s26   ;;  %s1712_s26 = sphi %s1769_s26, %s20_s26   ;;  %s1708_s25 = sphi %s1767_s25, %s2323_s25   ;;  %s1704_s24 = sphi %s1765_s24, %s2322_s24   ;;  %s1700_s23 = sphi %s1763_s23, %s2321_s23   ;;  %s1696_s22 = sphi %s1761_s22, %s2320_s22   ;;  %s1692_s21 = sphi %s1759_s21, %s2319_s21  }
   0x6   : > { %p176_p0 = scmp.ne.s32.totalorder %s1700_s23, %s1696_s22  ;;  %p177_p1 = scmp.eq.s32.totalorder %s1712_s26, 0 }
   0x7   : > { %p182_p2 = scmp.ne.s32.totalorder %s1696_s22, %s1692_s21  ;;  %p1792_p3 = scmp.eq.s32.totalorder %s1351_s27, 0 }
   0x8   : > { %p1352_p4 = scmp.ge.s32.totalorder %s1712_s26, 1  ;;  %p178_p5 = por %p177_p1, %p176_p0 }
   0x9   : > { %p219_p6 = scmp.lt.s32.totalorder %s1712_s26, 3  ;;  %p1800_p7 = por %p1792_p3, %p182_p2 }
   0xa   : > { %s1714_s7 = smov [#allocation7]   ;;  %p1421_p11 = scmp.lt.s32.totalorder %s1712_s26, 2 }
   0xb   : > { %s2313_s29 = scalar_select %p1800_p7, 1, 0 }
   0xc   : > { %p1804_p8 = pnand %p1352_p4, %p219_p6  ;;  %s252_s8 = sshll.u32 %s1714_s7, 4  ;;  %s253_s8 = int_to_ptr.vmem [resolvable:$true] %s252_s8 }
   0xd   : > { %s169_s10 = sadd.s32 1, %s1700_s23  ;;  %p1818_p12 = pnand %p1421_p11, %p178_p5 }
   0xe   : > { %p1412_p9 = pneg %p1804_p8  ;;  %s1615_s12 = scalar_lea.vmem %s253_s8, 512 }
   0xf   : > { %p1616_p0 = scmp.ne.s32.totalorder %s253_s8, %s1615_s12  ;;  %p1623_p4 = scmp.lt.s32.totalorder %s253_s8, %s253_s8 }
  0x10   : > { %p1812_p10 = pnand %p1412_p9, %p1792_p3  ;;  %p1624_p6 = scmp.lt.s32.totalorder %s1615_s12, %s1615_s12 }
  0x12   : > { %p1606_p13 = pneg %p1812_p10  ;;  %p1625_p7 = por %p1624_p6, %p1623_p4 }
  0x14   : > { %p1618_p1 = pnand %p1616_p0, %p1606_p13 }
  0x16   : > { %p1619_p2 = pneg %p1618_p1 }
  0x18   : > { %p1626_p9 = pnand %p1625_p7, %p1619_p2 }
  0x1a   : > { %1629 = shalt.err (!%p1626_p9)
}
  0x1b   : > { %s1715_s13 = smov 128   ;;  %s1716_s14 = smov 8  }
  0x1c   : > { %1415 = dma.hbm_to_vmem [thread:$0]  (!%p1812_p10), %s2304_s2, 512, %s253_s8, [#allocation8], %s1715_s13, %s1715_s13, %s1716_s14  }
  0x1d   : > { %s29_s17 = sadd.s32 1, %s1708_s25  ;;  %s284_s18 = sand.u32 1, %s1700_s23  }
  0x1e   : > { %p30_p5 = scmp.ge.s32.totalorder %s29_s17, 2  ;;  %s1359_s19 = sshll.u32 %s284_s18, 7 }
  0x1f   : > { %s1401_s20 = sshll.u32 %s1708_s25, 9  ;;  %s288_s9 = scalar_lea.vmem [#allocation9], %s1359_s19 }
  0x20   : > { %s2325_s17 = smov (%p30_p5, %s29_s17), 0  ;;  %s1837_s7 = scalar_lea.hbm %s2307_s5, %s1401_s20 }
  0x21   : > { %s166_s12 = ssub.s32 %s1708_s25, %s2325_s17  ;;  %s295_s26 = sshll.u32 %s288_s9, 4  ;;  %s296_s26 = int_to_ptr.vmem [resolvable:$true] %s295_s26 }
  0x22   : > { %p167_p7 = scmp.eq.s32.totalorder %s166_s12, 0  ;;  %s285_s8 = scalar_lea.sflag [#allocation10], %s284_s18 }
  0x23   : > { %p1632_p10 = pneg %p1818_p12  ;;  %s1643_s13 = scalar_lea.vmem %s296_s26, 2048 }
  0x24   : > { %s1842_s15 = scalar_select %p167_p7, %s1700_s23, %s169_s10  }
  0x25   : > { %p1644_p11 = scmp.ne.s32.totalorder %s296_s26, %s1643_s13  ;;  %s1717_s14 = smov [#allocation9]  }
  0x26   : > { %s1648_s16 = sshll.u32 %s1717_s14, 4  ;;  %s1649_s16 = int_to_ptr.vmem [resolvable:$false] %s1648_s16 }
  0x27   : > { %p1646_p13 = pnand %p1644_p11, %p1632_p10  ;;  %s1650_s21 = scalar_lea.vmem %s1649_s16, 4096 }
  0x28   : > { %p1651_p1 = scmp.lt.s32.totalorder %s296_s26, %s1649_s16  ;;  %p1652_p2 = scmp.lt.s32.totalorder %s1650_s21, %s1643_s13 }
  0x29   : > { %p1647_p0 = pneg %p1646_p13 }
  0x2a   : > { %p1653_p4 = por %p1652_p2, %p1651_p1 }
  0x2c   : > { %p1654_p6 = pnand %p1653_p4, %p1647_p0 }
  0x2e   : > { %1657 = shalt.err (!%p1654_p6)
}
  0x2f   : > { %s1718_s19 = smov 1024   ;;  %s1719_s10 = smov 512  }
  0x30   : > { %s1720_s18 = smov 32   ;;  %307 = sbr.rel (%p1804_p8) target bundleno = 976 (0x3d0), region = 44 }
  0x31   : > { %1419 = dma.hbm_to_vmem [thread:$0]  (!%p1818_p12), %s1837_s7, 2048, %s296_s26, %s285_s8, %s1718_s19, %s1719_s10, %s1720_s18  }
  0x35   : > { %1683 = dma.done.wait (%p1792_p3), [#allocation8], 512  }
  0x36   : > { %1685 = vsyncadd (%p1792_p3), [#allocation8], 4294966784  ;;  %s313_s20 = sand.u32 1, %s1696_s22   ;;  %p2317_p9 = scmp.ne.s32.totalorder %s2313_s29, 0 }
  0x37   : > { %s1364_s27 = sshll.u32 %s313_s20, 7  ;;  %s314_s12 = scalar_lea.sflag [#allocation10], %s313_s20 }
  0x38   : > { %s1856_s9 = scalar_lea.vmem [#allocation9], %s1364_s27 }
  0x39   : > { %1687 = dma.done.wait (%p2317_p9), %s314_s12, 2048  }
  0x3a   : > { %1689 = vsyncadd (%p2317_p9), %s314_s12, 4294965248  ;;  %p1365_p8 = scmp.ne.s32.totalorder %s1704_s24, 0 }
  0x3c   : > { %402 = sbr.rel (%p1365_p8) target bundleno = 223 (0xdf), region = 56 }
  0x41   : > { %v405_v0 = vld [vmem:[%s2302_s0 + $0x10] sm:$0xff]  ;;  %vm427_vm0 = vcmask 257024   ;;  %vm440_vm1 = vcmask 261120   ;;  %v403_v2 = vld [vmem:[%s2302_s0] sm:$0xff]  ;;  %vm457_vm2 = vcmask 7168   ;;  %v406_v7 = vld [vmem:[%s2302_s0 + $0x18] sm:$0xff] }
  0x42   : > { %v434_v1 = vld [vmem:[%s2303_s1 + $0x10] sm:$0xff]  ;;  %v409_v4 = vmul.f32 5.0, %v405_v0  ;;  %v432_v5 = vld [vmem:[%s2303_s1] sm:$0xff]  ;;  %v407_v6 = vmul.f32 5.0, %v403_v2  ;;  %v435_v8 = vld [vmem:[%s2303_s1 + $0x18] sm:$0xff]  ;;  %v410_v10 = vmul.f32 5.0, %v406_v7 }
  0x43   : > { %v438_v3 = vmul.f32 %v434_v1, %v405_v0  ;;  %v436_v9 = vmul.f32 %v432_v5, %v403_v2  ;;  %v439_v11 = vmul.f32 %v435_v8, %v406_v7  ;;  %v404_v12 = vld [vmem:[%s2302_s0 + $0x8] sm:$0xff]  ;;  %v463_v14 = vld [vmem:[#allocation7 + $0x8] sm:$0xff]  ;;  %v1721_v15 = vmov -inf   ;;  %v462_v20 = vld [vmem:[#allocation7] sm:$0xff] }
  0x44   : > { %v433_v13 = vld [vmem:[%s2303_s1 + $0x8] sm:$0xff]  ;;  %490 = vst.msk [vmem:[#allocation3] sm:$0xff] %vm457_vm2, %v1721_v15  ;;  %491 = vst.msk [vmem:[#allocation3 + $0x8] sm:$0xff] %vm457_vm2, %v1721_v15  ;;  %v1404_v17 = vpack.c.bf16 %v409_v4, %v409_v4  ;;  %v1402_v18 = vpack.c.bf16 %v407_v6, %v407_v6  ;;  %v408_v19 = vmul.f32 5.0, %v404_v12  ;;  %v1722_v21 = vmov 0.0   ;;  %v464_v31 = vld [vmem:[#allocation7 + $0x10] sm:$0xff] }
  0x45   : > { %492 = vst.msk [vmem:[#allocation3 + $0x10] sm:$0xff] %vm457_vm2, %v1721_v15  ;;  %493 = vst.msk [vmem:[#allocation3 + $0x18] sm:$0xff] %vm457_vm2, %v1721_v15  ;;  %v447_v16 = vsel %vm440_vm1, %v438_v3, 0.0  ;;  %v441_v22 = vsel %vm440_vm1, %v436_v9, 0.0  ;;  %v1405_v23 = vpack.c.bf16 %v410_v10, %v410_v10  ;;  %v437_v24 = vmul.f32 %v433_v13, %v404_v12  ;;  %v465_v30 = vld [vmem:[#allocation7 + $0x18] sm:$0xff] }
  0x46   : > { %494 = vst.msk [vmem:[#allocation4] sm:$0xff] %vm457_vm2, %v1722_v21  ;;  %495 = vst.msk [vmem:[#allocation4 + $0x8] sm:$0xff] %vm457_vm2, %v1722_v21  ;;  %448 = vadd.xlane.f32.xlu1 %v447_v16  ;;  %442 = vadd.xlane.f32.xlu0 %v441_v22  ;;  %v450_v25 = vsel %vm440_vm1, %v439_v11, 0.0  ;;  %v1403_v26 = vpack.c.bf16 %v408_v19, %v408_v19  ;;  %v467_v27 = vmul.f32 %v463_v14, %v404_v12 }
  0x47   : > { %496 = vst.msk [vmem:[#allocation4 + $0x10] sm:$0xff] %vm457_vm2, %v1722_v21  ;;  %497 = vst.msk [vmem:[#allocation4 + $0x18] sm:$0xff] %vm457_vm2, %v1722_v21  ;;  %v444_v28 = vsel %vm440_vm1, %v437_v24, 0.0  ;;  %v466_v29 = vmul.f32 %v462_v20, %v403_v2  ;;  %v469_v33 = vmul.f32 %v465_v30, %v406_v7  ;;  %v468_v35 = vmul.f32 %v464_v31, %v405_v0 }
  0x48   : > { %430 = vst.msk [vmem:[#allocation2 + $0x8] sm:$0xf] %vm427_vm0, %v1404_v17  ;;  %428 = vst.msk [vmem:[#allocation2] sm:$0xf] %vm427_vm0, %v1402_v18  ;;  %v473_v32 = vsel %vm440_vm1, %v467_v27, 0.0 }
  0x49   : > { %431 = vst.msk [vmem:[#allocation2 + $0xc] sm:$0xf] %vm427_vm0, %v1405_v23  ;;  %429 = vst.msk [vmem:[#allocation2 + $0x4] sm:$0xf] %vm427_vm0, %v1403_v26  ;;  %v470_v34 = vsel %vm440_vm1, %v466_v29, 0.0  ;;  %v479_v36 = vsel %vm440_vm1, %v469_v33, 0.0 }
  0x4a   : > { %451 = vadd.xlane.f32.xlu1 %v450_v25  ;;  %445 = vadd.xlane.f32.xlu0 %v444_v28  ;;  %v476_v37 = vsel %vm440_vm1, %v468_v35, 0.0 }
  0x4e   : > { %474 = vadd.xlane.f32.xlu1 %v473_v32  ;;  %471 = vadd.xlane.f32.xlu0 %v470_v34 }
  0x52   : > { %480 = vadd.xlane.f32.xlu1 %v479_v36  ;;  %477 = vadd.xlane.f32.xlu0 %v476_v37 }
  0xcf   : > { %v449_v38 = vpop.xlane.xlu1 %448  ;;  %v443_v40 = vpop.xlane.xlu0 %442 }
  0xd0   : > { %v455_v39 = vmul.f32 5.0, %v449_v38  ;;  %v453_v41 = vmul.f32 5.0, %v443_v40 }
  0xd2   : > { %460 = vst.msk [vmem:[#allocation5 + $0x10] sm:$0xff] %vm457_vm2, %v455_v39  ;;  %458 = vst.msk [vmem:[#allocation5] sm:$0xff] %vm457_vm2, %v453_v41 }
  0xd3   : > { %v452_v42 = vpop.xlane.xlu1 %451  ;;  %v446_v44 = vpop.xlane.xlu0 %445 }
  0xd4   : > { %v456_v43 = vmul.f32 5.0, %v452_v42  ;;  %v454_v45 = vmul.f32 5.0, %v446_v44 }
  0xd6   : > { %461 = vst.msk [vmem:[#allocation5 + $0x18] sm:$0xff] %vm457_vm2, %v456_v43  ;;  %459 = vst.msk [vmem:[#allocation5 + $0x8] sm:$0xff] %vm457_vm2, %v454_v45 }
  0xd7   : > { %v475_v46 = vpop.xlane.xlu1 %474  ;;  %v472_v48 = vpop.xlane.xlu0 %471 }
  0xd8   : > { %v483_v47 = vmul.f32 5.0, %v475_v46  ;;  %v482_v49 = vmul.f32 5.0, %v472_v48 }
  0xda   : > { %487 = vst.msk [vmem:[#allocation6 + $0x8] sm:$0xff] %vm457_vm2, %v483_v47  ;;  %486 = vst.msk [vmem:[#allocation6] sm:$0xff] %vm457_vm2, %v482_v49 }
  0xdb   : > { %v481_v50 = vpop.xlane.xlu1 %480  ;;  %v478_v52 = vpop.xlane.xlu0 %477 }
  0xdc   : > { %v485_v51 = vmul.f32 5.0, %v481_v50  ;;  %v484_v53 = vmul.f32 5.0, %v478_v52 }
  0xde   : > { %489 = vst.msk [vmem:[#allocation6 + $0x18] sm:$0xff] %vm457_vm2, %v485_v51  ;;  %488 = vst.msk [vmem:[#allocation6 + $0x10] sm:$0xff] %vm457_vm2, %v484_v53 }
  0xdf PF: > { %v510_v54 = vld [vmem:[%s1856_s9 + $0x40] sm:$0xff]  ;;  %v511_v56 = vld [vmem:[%s1856_s9 + $0x48] sm:$0xff]  ;;  %v1723_v62 = vmov 0   ;;  %v512_v5 = vld [vmem:[%s1856_s9 + $0x50] sm:$0xff]  ;;  %vm608_vm3 = vcmask 261120   ;;  %vm1047_vm4 = vcmask 7168  }
  0xe0   : > { %v514_v55 = vld [vmem:[%s1856_s9 + $0x60] sm:$0xff]  ;;  %v515_v58 = vld [vmem:[%s1856_s9 + $0x68] sm:$0xff]  ;;  %647 = vmatprep.mubr.bf16.mxu0 %v1723_v62  ;;  %700 = vmatprep.mubr.bf16.mxu1 %v1723_v62  ;;  %v516_v7 = vld [vmem:[%s1856_s9 + $0x70] sm:$0xff]  ;;  %p1396_p3 = scmp.ne.s32.totalorder %s1704_s24, 1 }
  0xe1   : > { %v1381_v57 = vcombine.high %v510_v54, %v514_v55  ;;  %v1380_v59 = vcombine.low %v510_v54, %v514_v55  ;;  %v502_v60 = vld [vmem:[%s1856_s9] sm:$0xff]  ;;  %v1383_v63 = vcombine.high %v511_v56, %v515_v58  ;;  %v1382_v0 = vcombine.low %v511_v56, %v515_v58  ;;  %v503_v2 = vld [vmem:[%s1856_s9 + $0x8] sm:$0xff]  ;;  %1480 = vset.pattern.permute.xlu0 %v1723_v62  ;;  %v513_v8 = vld [vmem:[%s1856_s9 + $0x58] sm:$0xff] }
  0xe2   : > { %v506_v61 = vld [vmem:[%s1856_s9 + $0x20] sm:$0xff]  ;;  %v507_v3 = vld [vmem:[%s1856_s9 + $0x28] sm:$0xff]  ;;  %1481 = vset.pattern.permute.xlu1 %v1723_v62  ;;  %v517_v9 = vld [vmem:[%s1856_s9 + $0x78] sm:$0xff]  ;;  %v1385_v11 = vcombine.high %v512_v5, %v516_v7  ;;  %v1384_v16 = vcombine.low %v512_v5, %v516_v7 }
  0xe3   : > { %v1373_v1 = vcombine.high %v502_v60, %v506_v61  ;;  %627 = vmatprep.subr.bf16.mxu0 %v1381_v57  ;;  %v1375_v4 = vcombine.high %v503_v2, %v507_v3  ;;  %680 = vmatprep.subr.bf16.mxu1 %v1383_v63  ;;  %v1372_v6 = vcombine.low %v502_v60, %v506_v61  ;;  %v1482_v13 = vld [vmem:[#allocation2] sm:$0xff]   ;;  %v505_v17 = vld [vmem:[%s1856_s9 + $0x18] sm:$0xff] }
  0xe4   : > { %628 = vmatpush1.bf16.msra.mxu0 %v1380_v59  ;;  %681 = vmatpush1.bf16.msra.mxu1 %v1382_v0  ;;  %v1374_v10 = vcombine.low %v503_v2, %v507_v3  ;;  %v1387_v12 = vcombine.high %v513_v8, %v517_v9  ;;  %v504_v14 = vld [vmem:[%s1856_s9 + $0x10] sm:$0xff]  ;;  %v509_v18 = vld [vmem:[%s1856_s9 + $0x38] sm:$0xff]  ;;  %v1386_v19 = vcombine.low %v513_v8, %v517_v9 }
  0xe5   : > { %629 = vmatprep.subr.bf16.mxu0 %v1373_v1  ;;  %682 = vmatprep.subr.bf16.mxu1 %v1375_v4  ;;  %v508_v15 = vld [vmem:[%s1856_s9 + $0x30] sm:$0xff]  ;;  %v1379_v21 = vcombine.high %v505_v17, %v509_v18  ;;  %v1378_v23 = vcombine.low %v505_v17, %v509_v18  ;;  %v1483_v24 = vld [vmem:[#allocation2 + $0x8] sm:$0xff]  }
  0xe6   : > { %v1377_v20 = vcombine.high %v504_v14, %v508_v15  ;;  %v1376_v22 = vcombine.low %v504_v14, %v508_v15 }
  0xe8   : > { %630 = vmatpush1.bf16.msra.mxu0 %v1372_v6  ;;  %683 = vmatpush1.bf16.msra.mxu1 %v1374_v10 }
  0xe9   : > { %733 = vmatprep.subr.bf16.mxu0 %v1385_v11  ;;  %786 = vmatprep.subr.bf16.mxu1 %v1387_v12 }
  0xeb   : > { %1388 = vmatmul.mubr.msk.bf16.vlgmr.msra.gmra.mxu0 %vm608_vm3, %v1482_v13  ;;  %1390 = vmatmul.mubr.msk.bf16.vlgmr.msra.gmra.mxu1 %vm608_vm3, %v1482_v13 }
  0xec   : > { %734 = vmatpush1.bf16.msra.mxu0 %v1384_v16  ;;  %787 = vmatpush1.bf16.msra.mxu1 %v1386_v19 }
  0xed   : > { %657 = vmatprep.mubr.bf16.mxu0 %v1723_v62  ;;  %710 = vmatprep.mubr.bf16.mxu1 %v1723_v62 }
  0xee   : > { %735 = vmatprep.subr.bf16.mxu0 %v1377_v20  ;;  %788 = vmatprep.subr.bf16.mxu1 %v1379_v21  ;;  %v2035_v21 = vld [vmem:[#allocation3] sm:$0xff] }
  0xf0   : > { %736 = vmatpush1.bf16.msra.mxu0 %v1376_v22  ;;  %789 = vmatpush1.bf16.msra.mxu1 %v1378_v23 }
  0xf3   : > { %1389 = vmatmul.mubr.msk.bf16.gmra.mxu0 %vm608_vm3, %v1483_v24  ;;  %1391 = vmatmul.mubr.msk.bf16.gmra.mxu1 %vm608_vm3, %v1483_v24 }
  0xf4   : > { %753 = vmatprep.mubr.bf16.mxu0 %v1723_v62  ;;  %806 = vmatprep.mubr.bf16.mxu1 %v1723_v62 }
  0xfb   : > { %1392 = vmatmul.mubr.msk.bf16.vlgmr.msra.gmra.mxu0 %vm608_vm3, %v1482_v13  ;;  %1394 = vmatmul.mubr.msk.bf16.vlgmr.msra.gmra.mxu1 %vm608_vm3, %v1482_v13 }
  0xfc   : > { %763 = vmatprep.mubr.bf16.mxu0 %v1723_v62  ;;  %816 = vmatprep.mubr.bf16.mxu1 %v1723_v62 }
 0x103   : > { %1393 = vmatmul.mubr.msk.bf16.gmra.mxu0 %vm608_vm3, %v1483_v24  ;;  %1395 = vmatmul.mubr.msk.bf16.gmra.mxu1 %vm608_vm3, %v1483_v24  ;;  %v2040_v24 = vld [vmem:[#allocation3 + $0x8] sm:$0xff] }
 0x1ab   : > { %v1939_v25 = vpop.f32.mrf.mxu0  ;;  %v1941_v26 = vpop.f32.mrf.mxu1 }
 0x1ad   : > { %v1943_v27 = vpop.f32.mrf.mxu0  ;;  %v1945_v28 = vpop.f32.mrf.mxu1 }
 0x1ae   : > { %v831_v32 = vmax.f32 %v1939_v25, %v1943_v27 }
 0x1af   : > { %v1947_v29 = vpop.f32.mrf.mxu0  ;;  %v1949_v30 = vpop.f32.mrf.mxu1 }
 0x1b0   : > { %v832_v37 = vmax.f32 %v831_v32, %v1941_v26 }
 0x1b1   : > { %v1951_v31 = vpop.f32.mrf.mxu0  ;;  %v1955_v33 = vpop.f32.mrf.mxu1 }
 0x1b2   : > { %v840_v38 = vmax.f32 %v1947_v29, %v1951_v31  ;;  %v833_v43 = vmax.f32 %v832_v37, %v1945_v28 }
 0x1b3   : > { %v1957_v34 = vpop.f32.mrf.mxu0  ;;  %v1959_v35 = vpop.f32.mrf.mxu1 }
 0x1b4   : > { %v841_v44 = vmax.f32 %v840_v38, %v1949_v30 }
 0x1b5   : > { %v1961_v36 = vpop.f32.mrf.mxu0  ;;  %v1966_v39 = vpop.f32.mrf.mxu1 }
 0x1b6   : > { %v849_v45 = vmax.f32 %v1957_v34, %v1961_v36  ;;  %v842_v51 = vmax.f32 %v841_v44, %v1955_v33 }
 0x1b7   : > { %v1968_v40 = vpop.f32.mrf.mxu0  ;;  %v1970_v41 = vpop.f32.mrf.mxu1 }
 0x1b8   : > { %v850_v52 = vmax.f32 %v849_v45, %v1959_v35 }
 0x1b9   : > { %v1972_v42 = vpop.f32.mrf.mxu0  ;;  %v1978_v46 = vpop.f32.mrf.mxu1 }
 0x1ba   : > { %v858_v53 = vmax.f32 %v1968_v40, %v1972_v42  ;;  %v851_v61 = vmax.f32 %v850_v52, %v1966_v39 }
 0x1bb   : > { %v1980_v47 = vpop.f32.mrf.mxu0  ;;  %v1983_v49 = vpop.f32.mrf.mxu1 }
 0x1bc   : > { %v834_v48 = vmax.f32 %v833_v43, %v1980_v47  ;;  %v859_v62 = vmax.f32 %v858_v53, %v1970_v41  ;;  %v2050_v43 = vld [vmem:[#allocation3 + $0x10] sm:$0xff] }
 0x1bd   : > { %v1985_v50 = vpop.f32.mrf.mxu0  ;;  %v1992_v55 = vpop.f32.mrf.mxu1 }
 0x1be   : > { %v835_v54 = vmax.f32 %v834_v48, %v1985_v50  ;;  %v860_v7 = vmax.f32 %v859_v62, %v1978_v46 }
 0x1bf   : > { %v1994_v56 = vpop.f32.mrf.mxu0  ;;  %v1997_v58 = vpop.f32.mrf.mxu1 }
 0x1c0   : > { %v843_v57 = vmax.f32 %v842_v51, %v1994_v56  ;;  %v836_v59 = vmax.f32 %v835_v54, %v1983_v49  ;;  %v2060_v51 = vld [vmem:[#allocation3 + $0x18] sm:$0xff] }
 0x1c1   : > { %v2000_v60 = vpop.f32.mrf.mxu0  ;;  %v2005_v0 = vpop.f32.mrf.mxu1 }
 0x1c2   : > { %v844_v63 = vmax.f32 %v843_v57, %v2000_v60  ;;  %v837_v1 = vmax.f32 %v836_v59, %v1992_v55 }
 0x1c3   : > { %v2008_v2 = vpop.f32.mrf.mxu0  ;;  %v2011_v4 = vpop.f32.mrf.mxu1 }
 0x1c4   : > { %v852_v3 = vmax.f32 %v851_v61, %v2008_v2  ;;  %838 = vmax.xlane.f32.xlu0 %v837_v1  ;;  %v845_v5 = vmax.f32 %v844_v63, %v1997_v58 }
 0x1c5   : > { %v2014_v6 = vpop.f32.mrf.mxu0  ;;  %v2018_v9 = vpop.f32.mrf.mxu1 }
 0x1c6   : > { %v853_v8 = vmax.f32 %v852_v3, %v2014_v6  ;;  %v846_v10 = vmax.f32 %v845_v5, %v2005_v0 }
 0x1c7   : > { %v2021_v11 = vpop.f32.mrf.mxu0  ;;  %v2025_v14 = vpop.f32.mrf.mxu1 }
 0x1c8   : > { %v861_v12 = vmax.f32 %v860_v7, %v2021_v11  ;;  %847 = vmax.xlane.f32.xlu0 %v846_v10  ;;  %v854_v13 = vmax.f32 %v853_v8, %v2011_v4 }
 0x1c9   : > { %v2027_v15 = vpop.f32.mrf.mxu0  ;;  %v2032_v19 = vpop.f32.mrf.mxu1 }
 0x1ca   : > { %v862_v16 = vmax.f32 %v861_v12, %v2027_v15  ;;  %v855_v17 = vmax.f32 %v854_v13, %v2018_v9 }
 0x1cc   : > { %v863_v18 = vmax.f32 %v862_v16, %v2025_v14  ;;  %856 = vmax.xlane.f32.xlu1 %v855_v17 }
 0x1ce   : > { %v864_v20 = vmax.f32 %v863_v18, %v2032_v19 }
 0x1d0   : > { %865 = vmax.xlane.f32.xlu1 %v864_v20 }
 0x24d   : > { %v839_v22 = vpop.xlane.xlu0 %838 }
 0x24e   : > { %v2038_v23 = vmax.f32 %v2035_v21, %v839_v22 }
 0x250   : > { %v875_v32 = vsub.f32 %v2035_v21, %v2038_v23  ;;  %1052 = vst.msk [vmem:[#allocation3] sm:$0xff] %vm1047_vm4, %v2038_v23  ;;  %893 = vperm.xlu0 %1480, %v2038_v23  }
 0x251   : > { %v848_v37 = vpop.xlane.xlu0 %847 }
 0x252   : > { %v2048_v38 = vmax.f32 %v2040_v24, %v848_v37 }
 0x254   : > { %v876_v44 = vsub.f32 %v2040_v24, %v2048_v38  ;;  %1053 = vst.msk [vmem:[#allocation3 + $0x8] sm:$0xff] %vm1047_vm4, %v2048_v38  ;;  %898 = vperm.xlu1 %1481, %v2048_v38  }
 0x255   : > { %v857_v45 = vpop.xlane.xlu1 %856 }
 0x256   : > { %v2058_v48 = vmax.f32 %v2050_v43, %v857_v45 }
 0x258   : > { %v877_v52 = vsub.f32 %v2050_v43, %v2058_v48  ;;  %1054 = vst.msk [vmem:[#allocation3 + $0x10] sm:$0xff] %vm1047_vm4, %v2058_v48  ;;  %903 = vperm.xlu1 %1481, %v2058_v48  }
 0x259   : > { %v866_v53 = vpop.xlane.xlu1 %865 }
 0x25a   : > { %v2068_v54 = vmax.f32 %v2060_v51, %v866_v53 }
 0x25c   : > { %v878_v57 = vsub.f32 %v2060_v51, %v2068_v54  ;;  %1055 = vst.msk [vmem:[#allocation3 + $0x18] sm:$0xff] %vm1047_vm4, %v2068_v54  ;;  %908 = vperm.xlu1 %1481, %v2068_v54   ;;  %v874_v54 = vld [vmem:[#allocation4 + $0x18] sm:$0xff] }
 0x2cb   : > { %v2075_v59 = vpop.permute.xlu0 %893 }
 0x2cc   : > { %v911_v61 = vsub.f32 %v1939_v25, %v2075_v59  ;;  %v912_v62 = vsub.f32 %v1943_v27, %v2075_v59  ;;  %v913_v63 = vsub.f32 %v1941_v26, %v2075_v59  ;;  %v914_v1 = vsub.f32 %v1945_v28, %v2075_v59 }
 0x2cd   : > { %v915_v7 = vsub.f32 %v1980_v47, %v2075_v59 }
 0x2ce   : > { %v943_v3 = vmul.f32 1.442695, %v911_v61  ;;  %v945_v5 = vmul.f32 1.442695, %v912_v62  ;;  %v947_v8 = vmul.f32 1.442695, %v913_v63 }
 0x2cf   : > { %v2087_v10 = vpop.permute.xlu1 %898  ;;  %v949_v12 = vmul.f32 1.442695, %v914_v1  ;;  %v951_v16 = vmul.f32 1.442695, %v915_v7 }
 0x2d0   : > { %v919_v25 = vsub.f32 %v1947_v29, %v2087_v10  ;;  %v920_v27 = vsub.f32 %v1951_v31, %v2087_v10  ;;  %v921_v26 = vsub.f32 %v1949_v30, %v2087_v10  ;;  %1484 = vpow2.f32 %v943_v3 }
 0x2d1   : > { %v922_v28 = vsub.f32 %v1955_v33, %v2087_v10  ;;  %1486 = vpow2.f32 %v945_v5  ;;  %v923_v17 = vsub.f32 %v1994_v56, %v2087_v10 }
 0x2d2   : > { %v959_v13 = vmul.f32 1.442695, %v919_v25  ;;  %v961_v47 = vmul.f32 1.442695, %v920_v27  ;;  %1488 = vpow2.f32 %v947_v8  ;;  %v963_v29 = vmul.f32 1.442695, %v921_v26 }
 0x2d3   : > { %v2099_v18 = vpop.permute.xlu1 %903  ;;  %1490 = vpow2.f32 %v949_v12  ;;  %v965_v33 = vmul.f32 1.442695, %v922_v28  ;;  %v967_v53 = vmul.f32 1.442695, %v923_v17  ;;  %v918_v25 = vsub.f32 %v1992_v55, %v2075_v59 }
 0x2d4   : > { %v927_v31 = vsub.f32 %v1957_v34, %v2099_v18  ;;  %v928_v30 = vsub.f32 %v1961_v36, %v2099_v18  ;;  %1492 = vpow2.f32 %v959_v13  ;;  %v929_v20 = vsub.f32 %v1959_v35, %v2099_v18 }
 0x2d5   : > { %1494 = vpow2.f32 %v961_v47  ;;  %v930_v22 = vsub.f32 %v1966_v39, %v2099_v18  ;;  %v931_v35 = vsub.f32 %v2008_v2, %v2099_v18  ;;  %v925_v28 = vsub.f32 %v1997_v58, %v2087_v10 }
 0x2d6   : > { %v975_v56 = vmul.f32 1.442695, %v927_v31  ;;  %1496 = vpow2.f32 %v951_v16  ;;  %v977_v37 = vmul.f32 1.442695, %v928_v30  ;;  %v979_v61 = vmul.f32 1.442695, %v929_v20 }
 0x2d7   : > { %v2109_v45 = vpop.permute.xlu1 %908  ;;  %1498 = vpow2.f32 %v963_v29  ;;  %v981_v39 = vmul.f32 1.442695, %v930_v22  ;;  %v983_v3 = vmul.f32 1.442695, %v931_v35  ;;  %v926_v17 = vsub.f32 %v2005_v0, %v2087_v10 }
 0x2d8   : > { %v935_v34 = vsub.f32 %v1968_v40, %v2109_v45  ;;  %v936_v36 = vsub.f32 %v1972_v42, %v2109_v45  ;;  %1500 = vpow2.f32 %v965_v33  ;;  %v937_v62 = vsub.f32 %v1970_v41, %v2109_v45 }
 0x2d9   : > { %1502 = vpow2.f32 %v975_v56  ;;  %v938_v63 = vsub.f32 %v1978_v46, %v2109_v45  ;;  %v916_v40 = vsub.f32 %v1985_v50, %v2075_v59  ;;  %v939_v2 = vsub.f32 %v2021_v11, %v2109_v45 }
 0x2da   : > { %1504 = vpow2.f32 %v977_v37  ;;  %v991_v1 = vmul.f32 1.442695, %v935_v34  ;;  %v993_v42 = vmul.f32 1.442695, %v936_v36  ;;  %v995_v7 = vmul.f32 1.442695, %v937_v62 }
 0x2db   : > { %1506 = vpow2.f32 %v967_v53  ;;  %v917_v41 = vsub.f32 %v1983_v49, %v2075_v59  ;;  %v924_v46 = vsub.f32 %v2000_v60, %v2087_v10  ;;  %v997_v12 = vmul.f32 1.442695, %v938_v63 }
 0x2dc   : > { %1508 = vpow2.f32 %v979_v61  ;;  %v953_v27 = vmul.f32 1.442695, %v916_v40  ;;  %v999_v11 = vmul.f32 1.442695, %v939_v2  ;;  %v932_v49 = vsub.f32 %v2014_v6, %v2099_v18 }
 0x2dd   : > { %v1485_v5 = vpop.eup %1484  ;;  %1510 = vpow2.f32 %v981_v39  ;;  %v955_v60 = vmul.f32 1.442695, %v917_v41  ;;  %v969_v55 = vmul.f32 1.442695, %v924_v46  ;;  %v957_v29 = vmul.f32 1.442695, %v918_v25 }
 0x2de   : > { %v1487_v8 = vpop.eup %1486  ;;  %1512 = vpow2.f32 %v991_v1  ;;  %v933_v31 = vsub.f32 %v2011_v4, %v2099_v18  ;;  %v940_v30 = vsub.f32 %v2027_v15, %v2109_v45  ;;  %v971_v6 = vmul.f32 1.442695, %v925_v28 }
 0x2df   : > { %v1489_v50 = vpop.eup %1488  ;;  %1514 = vpow2.f32 %v993_v42  ;;  %v1007_v47 = vadd.f32 %v1487_v8, %v1485_v5  ;;  %v934_v0 = vsub.f32 %v2018_v9, %v2099_v18  ;;  %v985_v10 = vmul.f32 1.442695, %v932_v49 }
 0x2e0   : > { %v1491_v26 = vpop.eup %1490  ;;  %1516 = vpow2.f32 %v983_v3  ;;  %v973_v37 = vmul.f32 1.442695, %v926_v17  ;;  %v941_v4 = vsub.f32 %v2025_v14, %v2109_v45  ;;  %v987_v34 = vmul.f32 1.442695, %v933_v31 }
 0x2e1   : > { %v1493_v13 = vpop.eup %1492  ;;  %1518 = vpow2.f32 %v995_v7  ;;  %v1008_v22 = vadd.f32 %v1489_v50, %v1007_v47  ;;  %v942_v15 = vsub.f32 %v2032_v19, %v2109_v45  ;;  %v1001_v39 = vmul.f32 1.442695, %v940_v30 }
 0x2e2   : > { %v1495_v16 = vpop.eup %1494  ;;  %1520 = vpow2.f32 %v997_v12  ;;  %v989_v18 = vmul.f32 1.442695, %v934_v0  ;;  %v1003_v1 = vmul.f32 1.442695, %v941_v4 }
 0x2e3   : > { %v1497_v59 = vpop.eup %1496  ;;  %1522 = vpow2.f32 %v953_v27  ;;  %v1016_v33 = vadd.f32 %v1495_v16, %v1493_v13  ;;  %v1009_v9 = vadd.f32 %v1491_v26, %v1008_v22  ;;  %v1005_v2 = vmul.f32 1.442695, %v942_v15 }
 0x2e4   : > { %v1499_v58 = vpop.eup %1498  ;;  %1524 = vpow2.f32 %v999_v11  ;;  %v881_v15 = vmul.f32 1.442695, %v876_v44 }
 0x2e5   : > { %v1501_v20 = vpop.eup %1500  ;;  %1526 = vpow2.f32 %v955_v60  ;;  %v1017_v35 = vadd.f32 %v1499_v58, %v1016_v33  ;;  %v1010_v45 = vadd.f32 %v1497_v59, %v1009_v9  ;;  %v873_v9 = vld [vmem:[#allocation4 + $0x10] sm:$0xff] }
 0x2e6   : > { %v1503_v56 = vpop.eup %1502  ;;  %1528 = vpow2.f32 %v969_v55 }
 0x2e7   : > { %v1505_v53 = vpop.eup %1504  ;;  %1530 = vpow2.f32 %v957_v29  ;;  %v1018_v3 = vadd.f32 %v1501_v20, %v1017_v35  ;;  %v885_v35 = vmul.f32 1.442695, %v878_v57 }
 0x2e8   : > { %v1507_v36 = vpop.eup %1506  ;;  %1532 = vpow2.f32 %v971_v6  ;;  %v1025_v61 = vadd.f32 %v1505_v53, %v1503_v56 }
 0x2e9   : > { %v1509_v62 = vpop.eup %1508  ;;  %1534 = vpow2.f32 %v985_v10  ;;  %v1019_v50 = vadd.f32 %v1507_v36, %v1018_v3  ;;  %v883_v36 = vmul.f32 1.442695, %v877_v52 }
 0x2ea   : > { %v1511_v63 = vpop.eup %1510  ;;  %1536 = vpow2.f32 %v973_v37  ;;  %v1026_v14 = vadd.f32 %v1509_v62, %v1025_v61 }
 0x2eb   : > { %v1513_v40 = vpop.eup %1512  ;;  %1538 = vpow2.f32 %v987_v34  ;;  %v879_v34 = vmul.f32 1.442695, %v875_v32  ;;  %v872_v32 = vld [vmem:[#allocation4 + $0x8] sm:$0xff] }
 0x2ec   : > { %v1515_v42 = vpop.eup %1514  ;;  %1540 = vpow2.f32 %v1001_v39  ;;  %v1027_v8 = vadd.f32 %v1511_v63, %v1026_v14  ;;  %v871_v39 = vld [vmem:[#allocation4] sm:$0xff] }
 0x2ed   : > { %v1517_v19 = vpop.eup %1516  ;;  %1542 = vpow2.f32 %v989_v18  ;;  %v1034_v5 = vadd.f32 %v1515_v42, %v1513_v40 }
 0x2ee   : > { %v1519_v7 = vpop.eup %1518  ;;  %1544 = vpow2.f32 %v1003_v1  ;;  %v1028_v49 = vadd.f32 %v1517_v19, %v1027_v8 }
 0x2ef   : > { %v1521_v41 = vpop.eup %1520  ;;  %v1035_v46 = vadd.f32 %v1519_v7, %v1034_v5  ;;  %1546 = vpow2.f32 %v1005_v2 }
 0x2f0   : > { %v1523_v12 = vpop.eup %1522  ;;  %1548 = vpow2.f32 %v879_v34 }
 0x2f1   : > { %v1525_v25 = vpop.eup %1524  ;;  %v1011_v27 = vadd.f32 %v1523_v12, %v1010_v45  ;;  %v1036_v11 = vadd.f32 %v1521_v41, %v1035_v46  ;;  %1550 = vpow2.f32 %v881_v15 }
 0x2f2   : > { %v1527_v26 = vpop.eup %1526  ;;  %1552 = vpow2.f32 %v883_v36 }
 0x2f3   : > { %v1529_v28 = vpop.eup %1528  ;;  %v1012_v13 = vadd.f32 %v1527_v26, %v1011_v27  ;;  %v1037_v29 = vadd.f32 %v1525_v25, %v1036_v11  ;;  %1554 = vpow2.f32 %v885_v35 }
 0x2f4   : > { %v1531_v60 = vpop.eup %1530  ;;  %v1020_v47 = vadd.f32 %v1529_v28, %v1019_v50 }
 0x2f5   : > { %v1533_v16 = vpop.eup %1532  ;;  %v1013_v17 = vadd.f32 %v1531_v60, %v1012_v13 }
 0x2f6   : > { %v1535_v55 = vpop.eup %1534  ;;  %v1021_v59 = vadd.f32 %v1533_v16, %v1020_v47 }
 0x2f7   : > { %v1537_v31 = vpop.eup %1536  ;;  %1014 = vadd.xlane.f32.xlu1 %v1013_v17  ;;  %v1029_v58 = vadd.f32 %v1535_v55, %v1028_v49 }
 0x2f8   : > { %v1539_v30 = vpop.eup %1538  ;;  %v1022_v6 = vadd.f32 %v1537_v31, %v1021_v59 }
 0x2f9   : > { %v1541_v33 = vpop.eup %1540  ;;  %v1030_v20 = vadd.f32 %v1539_v30, %v1029_v58 }
 0x2fa   : > { %v1543_v22 = vpop.eup %1542  ;;  %1023 = vadd.xlane.f32.xlu0 %v1022_v6  ;;  %v1038_v0 = vadd.f32 %v1541_v33, %v1037_v29 }
 0x2fb   : > { %v1545_v10 = vpop.eup %1544  ;;  %v1031_v56 = vadd.f32 %v1543_v22, %v1030_v20 }
 0x2fc   : > { %v1039_v37 = vadd.f32 %v1545_v10, %v1038_v0  ;;  %v1547_v4 = vpop.eup %1546 }
 0x2fd   : > { %1032 = vadd.xlane.f32.xlu1 %v1031_v56  ;;  %v1549_v61 = vpop.eup %1548 }
 0x2fe   : > { %v1040_v53 = vadd.f32 %v1547_v4, %v1039_v37  ;;  %v1551_v21 = vpop.eup %1550  ;;  %v887_v23 = vmul.f32 %v1549_v61, %v871_v39 }
 0x2ff   : > { %v1553_v38 = vpop.eup %1552  ;;  %v888_v44 = vmul.f32 %v1551_v21, %v872_v32 }
 0x300   : > { %v889_v52 = vmul.f32 %v1553_v38, %v873_v9  ;;  %v1555_v18 = vpop.eup %1554 }
 0x301   : > { %1041 = vadd.xlane.f32.xlu1 %v1040_v53  ;;  %v890_v63 = vmul.f32 %v1555_v18, %v874_v54 }
 0x380   : > { %v1015_v62 = vpop.xlane.xlu1 %1014 }
 0x381   : > { %v1043_v24 = vadd.f32 %v1015_v62, %v887_v23 }
 0x383   : > { %1048 = vst.msk [vmem:[#allocation4] sm:$0xff] %vm1047_vm4, %v1043_v24  ;;  %v1024_v43 = vpop.xlane.xlu0 %1023 }
 0x384   : > { %v1044_v48 = vadd.f32 %v1024_v43, %v888_v44 }
 0x386   : > { %1049 = vst.msk [vmem:[#allocation4 + $0x8] sm:$0xff] %vm1047_vm4, %v1044_v48  ;;  %v1033_v51 = vpop.xlane.xlu1 %1032 }
 0x387   : > { %v1045_v57 = vadd.f32 %v1033_v51, %v889_v52 }
 0x389   : > { %1050 = vst.msk [vmem:[#allocation4 + $0x10] sm:$0xff] %vm1047_vm4, %v1045_v57  ;;  %1059 = sbr.rel (%p1396_p3) target bundleno = 976 (0x3d0), region = 60 }
 0x38a   : > { %v1042_v1 = vpop.xlane.xlu1 %1041 }
 0x38b   : > { %v1046_v40 = vadd.f32 %v1042_v1, %v890_v63 }
 0x38d   : > { %1051 = vst.msk [vmem:[#allocation4 + $0x18] sm:$0xff] %vm1047_vm4, %v1046_v40 }
 0x38e   : > { %v1060_v14 = vld [vmem:[#allocation3] sm:$0xff]  ;;  %v1061_v45 = vld [vmem:[#allocation3 + $0x8] sm:$0xff]  ;;  %v1062_v50 = vld [vmem:[#allocation3 + $0x10] sm:$0xff] }
 0x38f   : > { %v2164_v42 = vld [vmem:[#allocation5] sm:$0xff]  ;;  %v2174_v5 = vld [vmem:[#allocation5 + $0x8] sm:$0xff]  ;;  %v2190_v26 = vld [vmem:[#allocation5 + $0x10] sm:$0xff] }
 0x390   : > { %v2166_v3 = vld [vmem:[#allocation6] sm:$0xff]  ;;  %v2169_v2 = vmax.f32 %v1060_v14, %v2164_v42  ;;  %v2176_v7 = vld [vmem:[#allocation6 + $0x8] sm:$0xff]  ;;  %v2185_v25 = vmax.f32 %v1061_v45, %v2174_v5  ;;  %v2193_v49 = vmax.f32 %v1062_v50, %v2190_v26  ;;  %v2200_v55 = vld [vmem:[#allocation6 + $0x10] sm:$0xff] }
 0x391   : > { %v2172_v19 = vmax.f32 %v1060_v14, %v2166_v3  ;;  %v2188_v27 = vmax.f32 %v1061_v45, %v2176_v7  ;;  %v1063_v58 = vld [vmem:[#allocation3 + $0x18] sm:$0xff]  ;;  %v2211_v10 = vmax.f32 %v1062_v50, %v2200_v55  ;;  %v1064_v44 = vld [vmem:[#allocation4] sm:$0xff]  ;;  %v1065_v51 = vld [vmem:[#allocation4 + $0x8] sm:$0xff] }
 0x392   : > { %v1080_v41 = vsub.f32 %v2164_v42, %v2169_v2  ;;  %v1092_v8 = vsub.f32 %v1060_v14, %v2169_v2  ;;  %v1081_v47 = vsub.f32 %v2174_v5, %v2185_v25  ;;  %v1093_v16 = vsub.f32 %v1061_v45, %v2185_v25  ;;  %v2206_v30 = vld [vmem:[#allocation5 + $0x18] sm:$0xff] }
 0x393   : > { %v1144_v46 = vsub.f32 %v2166_v3, %v2172_v19  ;;  %v1156_v12 = vsub.f32 %v1060_v14, %v2172_v19  ;;  %v1145_v17 = vsub.f32 %v2176_v7, %v2188_v27  ;;  %v1157_v59 = vsub.f32 %v1061_v45, %v2188_v27  ;;  %v2208_v6 = vld [vmem:[#allocation6 + $0x18] sm:$0xff] }
 0x394   : > { %v1084_v11 = vmul.f32 1.442695, %v1080_v41  ;;  %v1096_v28 = vmul.f32 1.442695, %v1092_v8  ;;  %v1082_v29 = vsub.f32 %v2190_v26, %v2193_v49  ;;  %v1094_v31 = vsub.f32 %v1062_v50, %v2193_v49  ;;  %v1066_v8 = vld [vmem:[#allocation4 + $0x10] sm:$0xff] }
 0x395   : > { %v1148_v13 = vmul.f32 1.442695, %v1144_v46  ;;  %v1160_v60 = vmul.f32 1.442695, %v1156_v12  ;;  %v1086_v33 = vmul.f32 1.442695, %v1081_v47  ;;  %v2214_v56 = vmax.f32 %v1063_v58, %v2206_v30 }
 0x396   : > { %1556 = vpow2.f32 %v1084_v11  ;;  %v1098_v20 = vmul.f32 1.442695, %v1093_v16  ;;  %v1150_v22 = vmul.f32 1.442695, %v1145_v17  ;;  %v1162_v0 = vmul.f32 1.442695, %v1157_v59 }
 0x397   : > { %1558 = vpow2.f32 %v1096_v28  ;;  %v2217_v37 = vmax.f32 %v1063_v58, %v2208_v6  ;;  %v1088_v4 = vmul.f32 1.442695, %v1082_v29  ;;  %v1100_v53 = vmul.f32 1.442695, %v1094_v31  ;;  %v1067_v16 = vld [vmem:[#allocation4 + $0x18] sm:$0xff] }
 0x398   : > { %1560 = vpow2.f32 %v1148_v13  ;;  %v1146_v34 = vsub.f32 %v2200_v55, %v2211_v10  ;;  %v1158_v15 = vsub.f32 %v1062_v50, %v2211_v10  ;;  %v1083_v36 = vsub.f32 %v2206_v30, %v2214_v56 }
 0x399   : > { %1562 = vpow2.f32 %v1160_v60  ;;  %v1095_v35 = vsub.f32 %v1063_v58, %v2214_v56  ;;  %v1147_v61 = vsub.f32 %v2208_v6, %v2217_v37  ;;  %v1159_v23 = vsub.f32 %v1063_v58, %v2217_v37 }
 0x39a   : > { %1564 = vpow2.f32 %v1086_v33  ;;  %v1152_v39 = vmul.f32 1.442695, %v1146_v34  ;;  %v1164_v21 = vmul.f32 1.442695, %v1158_v15  ;;  %v1090_v32 = vmul.f32 1.442695, %v1083_v36 }
 0x39b   : > { %1566 = vpow2.f32 %v1098_v20  ;;  %v1102_v62 = vmul.f32 1.442695, %v1095_v35  ;;  %v1154_v24 = vmul.f32 1.442695, %v1147_v61  ;;  %v1166_v38 = vmul.f32 1.442695, %v1159_v23 }
 0x39c   : > { %1568 = vpow2.f32 %v1150_v22 }
 0x39d   : > { %1570 = vpow2.f32 %v1162_v0 }
 0x39e   : > { %1572 = vpow2.f32 %v1088_v4 }
 0x39f   : > { %1574 = vpow2.f32 %v1100_v53 }
 0x3a0   : > { %1576 = vpow2.f32 %v1152_v39 }
 0x3a1   : > { %1578 = vpow2.f32 %v1164_v21  ;;  %v1068_v21 = vld [vmem:[%s2305_s3] sm:$0xff] }
 0x3a2   : > { %1580 = vpow2.f32 %v1090_v32 }
 0x3a3   : > { %v1557_v9 = vpop.eup %1556  ;;  %1582 = vpow2.f32 %v1102_v62 }
 0x3a4   : > { %v1559_v43 = vpop.eup %1558  ;;  %1584 = vpow2.f32 %v1154_v24 }
 0x3a5   : > { %v1561_v48 = vpop.eup %1560  ;;  %v1104_v52 = vmul.f32 %v1559_v43, %v1064_v44  ;;  %1586 = vpow2.f32 %v1166_v38  ;;  %v1132_v38 = vld [vmem:[%s2306_s4] sm:$0xff] }
 0x3a6   : > { %v1563_v18 = vpop.eup %1562 }
 0x3a7   : > { %v1565_v54 = vpop.eup %1564  ;;  %v1108_v57 = vadd.f32 %v1557_v9, %v1104_v52  ;;  %v1168_v63 = vmul.f32 %v1563_v18, %v1064_v44  ;;  %v1069_v52 = vld [vmem:[%s2305_s3 + $0x8] sm:$0xff] }
 0x3a8   : > { %v1567_v1 = vpop.eup %1566 }
 0x3a9   : > { %v1569_v40 = vpop.eup %1568  ;;  %1588 = vlog2.f32 %v1108_v57  ;;  %v1172_v14 = vadd.f32 %v1561_v48, %v1168_v63  ;;  %v1105_v45 = vmul.f32 %v1567_v1, %v1065_v51  ;;  %v1133_v57 = vld [vmem:[%s2306_s4 + $0x8] sm:$0xff] }
 0x3aa   : > { %v1571_v41 = vpop.eup %1570 }
 0x3ab   : > { %v1573_v46 = vpop.eup %1572  ;;  %1590 = vlog2.f32 %v1172_v14  ;;  %v1109_v12 = vadd.f32 %v1565_v54, %v1105_v45  ;;  %v1169_v50 = vmul.f32 %v1571_v41, %v1065_v51 }
 0x3ac   : > { %v1575_v11 = vpop.eup %1574 }
 0x3ad   : > { %v1577_v28 = vpop.eup %1576  ;;  %1592 = vlog2.f32 %v1109_v12  ;;  %v1173_v13 = vadd.f32 %v1569_v40, %v1169_v50  ;;  %v1106_v60 = vmul.f32 %v1575_v11, %v1066_v8 }
 0x3ae   : > { %v1579_v47 = vpop.eup %1578 }
 0x3af   : > { %v1581_v17 = vpop.eup %1580  ;;  %1594 = vlog2.f32 %v1173_v13  ;;  %v1110_v59 = vadd.f32 %v1573_v46, %v1106_v60  ;;  %v1170_v29 = vmul.f32 %v1579_v47, %v1066_v8  ;;  %v1071_v13 = vld [vmem:[%s2305_s3 + $0x18] sm:$0xff] }
 0x3b0   : > { %v1583_v31 = vpop.eup %1582 }
 0x3b1   : > { %v1585_v58 = vpop.eup %1584  ;;  %1596 = vlog2.f32 %v1110_v59  ;;  %v1174_v33 = vadd.f32 %v1577_v28, %v1170_v29  ;;  %v1107_v20 = vmul.f32 %v1583_v31, %v1067_v16 }
 0x3b2   : > { %v1587_v22 = vpop.eup %1586 }
 0x3b3   : > { %1598 = vlog2.f32 %v1174_v33  ;;  %v1111_v0 = vadd.f32 %v1581_v17, %v1107_v20  ;;  %v1171_v4 = vmul.f32 %v1587_v22, %v1067_v16 }
 0x3b5   : > { %1600 = vlog2.f32 %v1111_v0  ;;  %v1175_v53 = vadd.f32 %v1585_v58, %v1171_v4 }
 0x3b6   : > { %v1589_v34 = vpop.eup %1588 }
 0x3b7   : > { %v1113_v15 = vmul.f32 0.6931472, %v1589_v34  ;;  %1602 = vlog2.f32 %v1175_v53 }
 0x3b8   : > { %v1591_v36 = vpop.eup %1590 }
 0x3b9   : > { %v1120_v35 = vadd.f32 %v1113_v15, %v2169_v2  ;;  %v1177_v61 = vmul.f32 0.6931472, %v1591_v36 }
 0x3ba   : > { %v1593_v39 = vpop.eup %1592 }
 0x3bb   : > { %v1124_v23 = vsub.f32 %v1120_v35, %v2164_v42  ;;  %v1184_v32 = vadd.f32 %v1177_v61, %v2172_v19  ;;  %v1115_v62 = vmul.f32 0.6931472, %v1593_v39 }
 0x3bc   : > { %v1595_v24 = vpop.eup %1594 }
 0x3bd   : > { %v1128_v44 = vmul.f32 %v1124_v23, %v1068_v21  ;;  %v1188_v9 = vsub.f32 %v1184_v32, %v2166_v3  ;;  %v1121_v2 = vadd.f32 %v1115_v62, %v2185_v25  ;;  %v1179_v43 = vmul.f32 0.6931472, %v1595_v24 }
 0x3be   : > { %v1597_v48 = vpop.eup %1596 }
 0x3bf   : > { %v1192_v42 = vmul.f32 %v1188_v9, %v1132_v38  ;;  %v1125_v19 = vsub.f32 %v1121_v2, %v2174_v5  ;;  %v1185_v18 = vadd.f32 %v1179_v43, %v2188_v27  ;;  %v1117_v51 = vmul.f32 0.6931472, %v1597_v48  ;;  %v1070_v27 = vld [vmem:[%s2305_s3 + $0x10] sm:$0xff] }
 0x3c0   : > { %v1599_v54 = vpop.eup %1598 }
 0x3c1   : > { %v1196_v3 = vadd.f32 %v1192_v42, %v1128_v44  ;;  %v1129_v63 = vmul.f32 %v1125_v19, %v1069_v52  ;;  %v1189_v25 = vsub.f32 %v1185_v18, %v2176_v7  ;;  %v1122_v1 = vadd.f32 %v1117_v51, %v2193_v49  ;;  %v1134_v49 = vld [vmem:[%s2306_s4 + $0x10] sm:$0xff] }
 0x3c2   : > { %v1601_v40 = vpop.eup %1600  ;;  %v1181_v14 = vmul.f32 0.6931472, %v1599_v54 }
 0x3c3   : > { %1200 = vst.msk [vmem:[%s2308_s6] sm:$0xff] %vm1047_vm4, %v1196_v3  ;;  %v1193_v5 = vmul.f32 %v1189_v25, %v1133_v57  ;;  %v1126_v45 = vsub.f32 %v1122_v1, %v2190_v26  ;;  %v1119_v41 = vmul.f32 0.6931472, %v1601_v40 }
 0x3c4   : > { %v1603_v8 = vpop.eup %1602  ;;  %v1186_v7 = vadd.f32 %v1181_v14, %v2211_v10 }
 0x3c5   : > { %v1197_v46 = vadd.f32 %v1193_v5, %v1129_v63  ;;  %v1123_v12 = vadd.f32 %v1119_v41, %v2214_v56  ;;  %v1183_v50 = vmul.f32 0.6931472, %v1603_v8  ;;  %v1130_v11 = vmul.f32 %v1126_v45, %v1070_v27  ;;  %v1135_v56 = vld [vmem:[%s2306_s4 + $0x18] sm:$0xff] }
 0x3c6   : > { %v1190_v28 = vsub.f32 %v1186_v7, %v2200_v55 }
 0x3c7   : > { %1201 = vst.msk [vmem:[%s2308_s6 + $0x8] sm:$0xff] %vm1047_vm4, %v1197_v46  ;;  %v1127_v26 = vsub.f32 %v1123_v12, %v2206_v30  ;;  %v1187_v10 = vadd.f32 %v1183_v50, %v2217_v37 }
 0x3c8   : > { %v1194_v60 = vmul.f32 %v1190_v28, %v1134_v49 }
 0x3c9   : > { %v1131_v47 = vmul.f32 %v1127_v26, %v1071_v13  ;;  %v1191_v55 = vsub.f32 %v1187_v10, %v2208_v6 }
 0x3ca   : > { %v1198_v16 = vadd.f32 %v1194_v60, %v1130_v11 }
 0x3cb   : > { %v1195_v17 = vmul.f32 %v1191_v55, %v1135_v56 }
 0x3cc   : > { %1202 = vst.msk [vmem:[%s2308_s6 + $0x10] sm:$0xff] %vm1047_vm4, %v1198_v16 }
 0x3cd   : > { %v1199_v59 = vadd.f32 %v1195_v17, %v1131_v47 }
 0x3cf   : > { %1203 = vst.msk [vmem:[%s2308_s6 + $0x18] sm:$0xff] %vm1047_vm4, %v1199_v59 }
 0x3d0 PF: > { %s2318_s28 = sld [smem:[#allocation13_spill]]  ;;  %s2319_s21 = smov %s1696_s22 }
 0x3d1   : > { %s2320_s22 = smov %s1700_s23  ;;  %s2321_s23 = smov %s1842_s15 }
 0x3d2   : > { %s2322_s24 = smov %s1708_s25  ;;  %s2323_s25 = smov %s2325_s17 }
 0x3d6   : > { %s20_s26 = sadd.s32 1, %s2318_s28  }
 0x3d7   : > { %p17_p12 = scmp.ge.s32.totalorder %s20_s26, 4  }
 0x3d9   :  { %19 = sbr.rel (!%p17_p12) target bundleno = 5 (0x5), region = 110 }
 0x3de   :  { %1226 = vsyncpa [#allocation8], 1 }
 0x3df   :  { %1228 = vsyncpa [#allocation8 + $0x1], 1 }
 0x3e0   :  { %1229 = vsyncpa [#allocation10], 1 }
 0x3e1   :  { %1231 = vsyncpa [#allocation10 + $0x1], 1 }

</bundles_post_ra>
